<compile_context>
chip_gen: v7x
topology: tpu7x:2x2x1
jax: 0.10.0
libtpu: 0.0.40
codegen_flags: <defaults>
</compile_context>

<pallas_src>
import functools

import jax
import jax.numpy as jnp
from jax import lax
from jax.experimental import pallas as pl
from jax.experimental.pallas import tpu as pltpu


def _sdpa_kernel(q_ref, kt_ref, v_ref, out_ref, attn_ref, *,
                 inv_temperature, scale_q):
    # Blocks: q (1, TQ, D), k^T (1, D, Lk), v (1, Lk, Dv),
    #         out (1, TQ, Dv), attn (1, TQ, Lk).
    q = q_ref[0]                                                   # (TQ, D)
    if scale_q:
        # f32 inputs: fold 1/temperature into q (TQ*D muls instead of TQ*Lk).
        q = q * jnp.asarray(inv_temperature, dtype=q.dtype)
    kt = kt_ref[0]                                                 # (D, Lk)
    v = v_ref[0]                                                   # (Lk, Dv)

    # scores = q @ k^T as a plain MN-layout MXU matmul (k already transposed
    # in the wrapper -> no per-tile XLU relayout), f32 accumulation.
    scores = jnp.dot(q, kt, preferred_element_type=jnp.float32)    # (TQ, Lk)
    if not scale_q:
        # Low-precision inputs: scale the f32 scores instead of narrow q.
        scores = scores * jnp.float32(inv_temperature)

    # Softmax over keys (matches nn.Softmax(dim=2)).
    m = jnp.max(scores, axis=-1, keepdims=True)
    e = jnp.exp(scores - m)
    denom = jnp.sum(e, axis=-1, keepdims=True)                     # (TQ, 1)

    # Reciprocal on the EUP slot + one Newton step (full f32 accuracy), then a
    # broadcast multiply instead of TQ*Lk VALU divides.
    inv = pl.reciprocal(denom, approx=True)
    inv = inv * (2.0 - denom * inv)
    attn = e * inv                                                 # (TQ, Lk) f32

    attn_ref[0] = attn.astype(attn_ref.dtype)

    # output = attn @ v   (MXU, f32 accumulate)
    out = jnp.dot(attn.astype(v.dtype), v, preferred_element_type=jnp.float32)
    out_ref[0] = out.astype(out_ref.dtype)


def _vmem_config():
    """(tile_budget_bytes, vmem_limit_bytes, kv_single_buffer) per TPU generation."""
    try:
        vmem_bytes = int(pltpu.get_tpu_info().vmem_capacity_bytes)
    except Exception:
        vmem_bytes = None

    MiB = 1024 * 1024
    if vmem_bytes is not None and vmem_bytes <= 96 * MiB:
        # v7x-class: 64 MiB VMEM per TensorCore. Keep the double-buffered
        # working set small and single-buffer the resident k/v tiles.
        return 20 * MiB, min(48 * MiB, int(vmem_bytes * 3 // 4)), True
    if vmem_bytes is not None:
        # v5e / v6e: 128 MiB VMEM. Prefer the biggest tiles (512-wide tiles hit
        # ~85% of HBM roofline vs ~63% at 256 on v6e).
        return 56 * MiB, 96 * MiB, False
    # Unknown generation: conservative.
    return 24 * MiB, 48 * MiB, False


def _choose_query_tile(Lq, Lk, D, Dv, q_isz, attn_isz, out_isz, budget_bytes):
    """Largest (8,128)-legal query tile whose working set fits the budget.

    Always returns a divisor of Lq (so the grid covers Lq exactly).
    """
    candidates = [t for t in (1024, 512, 256, 128, 64, 32, 16, 8)
                  if t <= Lq and Lq % t == 0]
    if not candidates:
        # Ragged / tiny Lq: one full-Lq tile per batch (block == full array dim
        # is always legal w.r.t. the (8,128) constraint).
        candidates = [Lq]

    def working_set(tq):
        return (2 * q_isz * tq * D            # q blocks (double-buffered)
                + 2 * out_isz * tq * Dv       # out blocks
                + 2 * attn_isz * tq * Lk      # attn blocks
                + 2 * q_isz * Lk * (D + Dv)   # resident k^T / v (worst case 2 bufs)
                + 3 * 4 * tq * Lk)            # f32 scores / exp / attn temporaries

    for tq in candidates:
        if working_set(tq) <= budget_bytes:
            return tq
    return candidates[-1]                     # smallest aligned tile as fallback


def scaled_dot_product_attention(q, k, v, temperature, *, attn_dtype=None):
    """q: (B, Lq, D), k: (B, Lk, D), v: (B, Lk, Dv) -> (output, attn)."""
    B, Lq, D = q.shape
    Bk, Lk, Dk = k.shape
    Bv, Lkv, Dv = v.shape
    assert (Bk, Dk) == (B, D) and (Bv, Lkv) == (B, Lk)

    attn_dtype = q.dtype if attn_dtype is None else jnp.dtype(attn_dtype)
    budget_bytes, vmem_limit_bytes, kv_single_buffer = _vmem_config()

    TQ = _choose_query_tile(
        Lq, Lk, D, Dv,
        jnp.dtype(q.dtype).itemsize,
        jnp.dtype(attn_dtype).itemsize,
        jnp.dtype(q.dtype).itemsize,
        budget_bytes)
    assert Lq % TQ == 0, (Lq, TQ)
    n_q_tiles = Lq // TQ

    # Transpose k once per call (B*Lk*D elements, tiny vs. the B*Lq*Lk attn
    # writeback) so every grid step feeds the MXU a plain MN-layout matmul.
    k_t = jnp.swapaxes(k, 1, 2)               # (B, D, Lk)

    kernel = functools.partial(
        _sdpa_kernel,
        inv_temperature=1.0 / float(temperature),
        scale_q=(jnp.dtype(q.dtype) == jnp.float32))

    out_shape = (
        jax.ShapeDtypeStruct((B, Lq, Dv), q.dtype),      # output
        jax.ShapeDtypeStruct((B, Lq, Lk), attn_dtype),   # attn
    )

    # Megacore: shard on batch when B >= 2 so the resident k/v tiles are not
    # duplicated / re-read by both cores; for B == 1 let the q-tile axis shard.
    dims = ("parallel", "arbitrary") if B >= 2 else ("parallel", "parallel")

    def _invoke(single_buffer_kv):
        kv_kwargs = (dict(pipeline_mode=pl.Buffered(1))
                     if single_buffer_kv else {})
        grid_spec = pltpu.PrefetchScalarGridSpec(
            num_scalar_prefetch=0,
            grid=(B, n_q_tiles),
            in_specs=[
                pl.BlockSpec((1, TQ, D), lambda b, qi: (b, qi, 0)),
                # k^T / v: same block for every q tile -> stays VMEM-resident.
                pl.BlockSpec((1, D, Lk), lambda b, qi: (b, 0, 0), **kv_kwargs),
                pl.BlockSpec((1, Lk, Dv), lambda b, qi: (b, 0, 0), **kv_kwargs),
            ],
            out_specs=[
                pl.BlockSpec((1, TQ, Dv), lambda b, qi: (b, qi, 0)),
                pl.BlockSpec((1, TQ, Lk), lambda b, qi: (b, qi, 0)),
            ],
        )
        return pl.pallas_call(
            kernel,
            out_shape=out_shape,
            grid_spec=grid_spec,
            compiler_params=pltpu.CompilerParams(
                dimension_semantics=dims,
                vmem_limit_bytes=vmem_limit_bytes,
            ),
        )(q, k_t, v)

    if kv_single_buffer:
        try:
            return _invoke(True)
        except Exception:
            # pipeline_mode / Buffered(1) not supported by this JAX build:
            # fall back to default double-buffering (correctness unaffected).
            pass
    return _invoke(False)


if __name__ == "__main__":
    # Small but tile-friendly shapes: exercises q-tiling (Lq=256) and
    # lane-dense (Lk=128) attn stores, yet runs in microseconds.
    B, Lq, Lk, D, Dv = 2, 256, 128, 32, 32
    temperature = float(D) ** 0.5  # standard 1/sqrt(d_k) scaling

    key = jax.random.PRNGKey(0)
    kq, kk, kv = jax.random.split(key, 3)
    q = jax.random.normal(kq, (B, Lq, D), dtype=jnp.float32)
    k = jax.random.normal(kk, (B, Lk, D), dtype=jnp.float32)
    v = jax.random.normal(kv, (B, Lk, Dv), dtype=jnp.float32)

    output, attn = scaled_dot_product_attention(q, k, v, temperature)
    jax.block_until_ready((output, attn))

    # Reference check against plain JAX (full f32 precision).
    scores_ref = jnp.einsum("bqd,bkd->bqk", q, k,
                            precision=lax.Precision.HIGHEST) / temperature
    attn_ref = jax.nn.softmax(scores_ref, axis=2)
    out_ref = jnp.einsum("bqk,bkd->bqd", attn_ref, v,
                         precision=lax.Precision.HIGHEST)
    assert jnp.allclose(attn, attn_ref, atol=1e-5, rtol=1e-5)
    assert jnp.allclose(output, out_ref, atol=1e-5, rtol=1e-5)

    print("KERNEL_OK")
</pallas_src>

<mosaic_0001>
module attributes {stable_mosaic.version = 11 : i64} {
  func.func @_sdpa_kernel(%arg0: i32, %arg1: i32, %arg2: memref<1x256x32xf32, #tpu.memory_space<vmem>>, %arg3: memref<1x32x128xf32, #tpu.memory_space<vmem>>, %arg4: memref<1x128x32xf32, #tpu.memory_space<vmem>>, %arg5: memref<1x256x32xf32, #tpu.memory_space<vmem>>, %arg6: memref<1x256x128xf32, #tpu.memory_space<vmem>>) attributes {dimension_semantics = [#tpu.dimension_semantics<parallel>, #tpu.dimension_semantics<arbitrary>], iteration_bounds = array<i64: 2, 1>, scalar_prefetch = 0 : i64, scratch_operands = 0 : i64, tpu.core_type = #tpu.core_type<tc>, window_params = [{transform_indices = @transform_0, window_bounds = array<i64: 1, 256, 32>}, {transform_indices = @transform_1, window_bounds = array<i64: 1, 32, 128>}, {transform_indices = @transform_2, window_bounds = array<i64: 1, 128, 32>}, {transform_indices = @transform_3, window_bounds = array<i64: 1, 256, 32>}, {transform_indices = @transform_4, window_bounds = array<i64: 1, 256, 128>}]} {
    %c0 = arith.constant 0 : index
    %c0_0 = arith.constant 0 : index
    %c0_1 = arith.constant 0 : index
    %0 = vector.load %arg2[%c0, %c0_0, %c0_1] : memref<1x256x32xf32, #tpu.memory_space<vmem>>, vector<1x256x32xf32>
    %1 = vector.shape_cast %0 : vector<1x256x32xf32> to vector<256x32xf32>
    %cst = arith.constant 0.176776692 : f32
    %2 = vector.broadcast %cst : f32 to vector<256x32xf32>
    %3 = arith.mulf %1, %2 : vector<256x32xf32>
    %c0_2 = arith.constant 0 : index
    %c0_3 = arith.constant 0 : index
    %c0_4 = arith.constant 0 : index
    %4 = vector.load %arg3[%c0_2, %c0_3, %c0_4] : memref<1x32x128xf32, #tpu.memory_space<vmem>>, vector<1x32x128xf32>
    %5 = vector.shape_cast %4 : vector<1x32x128xf32> to vector<32x128xf32>
    %c0_5 = arith.constant 0 : index
    %c0_6 = arith.constant 0 : index
    %c0_7 = arith.constant 0 : index
    %6 = vector.load %arg4[%c0_5, %c0_6, %c0_7] : memref<1x128x32xf32, #tpu.memory_space<vmem>>, vector<1x128x32xf32>
    %7 = vector.shape_cast %6 : vector<1x128x32xf32> to vector<128x32xf32>
    %cst_8 = arith.constant dense<0.000000e+00> : vector<256x128xf32>
    %8 = tpu.matmul %3, %5, %cst_8 {dimension_numbers = #tpu.dot_dimension_numbers<[1], [0], [0], [1], [0, 0, 1, 1], [], []>} : vector<256x32xf32>, vector<32x128xf32>, vector<256x128xf32> -> vector<256x128xf32>
    %cst_9 = arith.constant dense<0xFF800000> : vector<256xf32>
    %9 = vector.multi_reduction <maximumf>, %8, %cst_9 [1] : vector<256x128xf32> to vector<256xf32>
    %10 = vector.shape_cast %9 : vector<256xf32> to vector<256x1xf32>
    %11 = vector.broadcast %10 : vector<256x1xf32> to vector<256x128xf32>
    %12 = arith.subf %8, %11 : vector<256x128xf32>
    %13 = math.exp %12 : vector<256x128xf32>
    %cst_10 = arith.constant dense<0.000000e+00> : vector<256xf32>
    %14 = vector.multi_reduction <add>, %13, %cst_10 [1] : vector<256x128xf32> to vector<256xf32>
    %15 = vector.shape_cast %14 : vector<256xf32> to vector<256x1xf32>
    %16 = tpu.reciprocal %15 {approx = true} : vector<256x1xf32> -> vector<256x1xf32>
    %17 = arith.mulf %15, %16 : vector<256x1xf32>
    %cst_11 = arith.constant 2.000000e+00 : f32
    %18 = vector.broadcast %cst_11 : f32 to vector<256x1xf32>
    %19 = arith.subf %18, %17 : vector<256x1xf32>
    %20 = arith.mulf %16, %19 : vector<256x1xf32>
    %21 = vector.broadcast %20 : vector<256x1xf32> to vector<256x128xf32>
    %22 = arith.mulf %13, %21 : vector<256x128xf32>
    %c0_12 = arith.constant 0 : index
    %c0_13 = arith.constant 0 : index
    %c0_14 = arith.constant 0 : index
    %23 = vector.load %arg6[%c0_12, %c0_13, %c0_14] : memref<1x256x128xf32, #tpu.memory_space<vmem>>, vector<1x256x128xf32>
    %24 = vector.shape_cast %23 : vector<1x256x128xf32> to vector<256x128xf32>
    %25 = vector.shape_cast %22 : vector<256x128xf32> to vector<1x256x128xf32>
    tpu.vector_store %arg6[%c0_12, %c0_13, %c0_14], %25 {strides = array<i32>} : memref<1x256x128xf32, #tpu.memory_space<vmem>>, vector<1x256x128xf32>,
    %cst_15 = arith.constant dense<0.000000e+00> : vector<256x32xf32>
    %26 = tpu.matmul %22, %7, %cst_15 {dimension_numbers = #tpu.dot_dimension_numbers<[1], [0], [0], [1], [0, 0, 1, 1], [], []>} : vector<256x128xf32>, vector<128x32xf32>, vector<256x32xf32> -> vector<256x32xf32>
    %c0_16 = arith.constant 0 : index
    %c0_17 = arith.constant 0 : index
    %c0_18 = arith.constant 0 : index
    %27 = vector.load %arg5[%c0_16, %c0_17, %c0_18] : memref<1x256x32xf32, #tpu.memory_space<vmem>>, vector<1x256x32xf32>
    %28 = vector.shape_cast %27 : vector<1x256x32xf32> to vector<256x32xf32>
    %29 = vector.shape_cast %26 : vector<256x32xf32> to vector<1x256x32xf32>
    tpu.vector_store %arg5[%c0_16, %c0_17, %c0_18], %29 {strides = array<i32>} : memref<1x256x32xf32, #tpu.memory_space<vmem>>, vector<1x256x32xf32>,
    return
  }
  func.func @transform_0(%arg0: i32, %arg1: i32) -> (i32, i32, i32) {
    %c0_i32 = arith.constant 0 : i32
    %c0_i32_0 = arith.constant 0 : i32
    return %arg0, %arg1, %c0_i32 : i32, i32, i32
  }
  func.func @transform_1(%arg0: i32, %arg1: i32) -> (i32, i32, i32) {
    %c0_i32 = arith.constant 0 : i32
    %c0_i32_0 = arith.constant 0 : i32
    %c0_i32_1 = arith.constant 0 : i32
    return %arg0, %c0_i32, %c0_i32_0 : i32, i32, i32
  }
  func.func @transform_2(%arg0: i32, %arg1: i32) -> (i32, i32, i32) {
    %c0_i32 = arith.constant 0 : i32
    %c0_i32_0 = arith.constant 0 : i32
    %c0_i32_1 = arith.constant 0 : i32
    return %arg0, %c0_i32, %c0_i32_0 : i32, i32, i32
  }
  func.func @transform_3(%arg0: i32, %arg1: i32) -> (i32, i32, i32) {
    %c0_i32 = arith.constant 0 : i32
    %c0_i32_0 = arith.constant 0 : i32
    return %arg0, %arg1, %c0_i32 : i32, i32, i32
  }
  func.func @transform_4(%arg0: i32, %arg1: i32) -> (i32, i32, i32) {
    %c0_i32 = arith.constant 0 : i32
    %c0_i32_0 = arith.constant 0 : i32
    return %arg0, %arg1, %c0_i32 : i32, i32, i32
  }
}

</mosaic_0001>

<bundles_post_ra>
// kernel: tpu_custom_call.1
= control target key start
LH: loop header
LB: loop body
LE: loop exit
PB: predicated region body
PF: predicated region fallthrough
CT: control target
= control target key end

     0   :  { %10 = vsyncpa [#allocation3], 0  ;;  %s2770_s0 = inlined_call_operand.vmem [shape: f32[2,256,32], index: 0, kind: input, shape index: {}]   ;;  %s2771_s1 = inlined_call_operand.vmem [shape: f32[2,32,128], index: 1, kind: input, shape index: {}]   ;;  %s2772_s2 = inlined_call_operand.vmem [shape: f32[2,128,32], index: 2, kind: input, shape index: {}]   ;;  %s2773_s3 = inlined_call_operand.vmem [shape: f32[2,256,32], index: 3, kind: output, shape index: {0}]   ;;  %s2774_s4 = inlined_call_operand.hbm [shape: f32[2,256,128], index: 4, kind: output, shape index: {1}]  }
   0x1   :  { %12 = vsyncpa [#allocation3 + $0x1], 0  ;;  %s2164_s15 = smov 0   ;;  %s2166_s16 = smov 0  }
   0x2   :  { %s2168_s17 = smov 0   ;;  %s2170_s18 = smov 0  }
   0x3   :  { %s2172_s19 = smov 0   ;;  %s2174_s20 = smov 0  }
   0x4 LB: > { %s1539_s21 = sadd.s32 4294967295, %s2134_s20   ;;  %s1540_s22 = sadd.s32 4294967294, %s2134_s20   ;;  %s2134_s20 = sphi %s2174_s20, %s18_s20   ;;  %s2130_s19 = sphi %s2172_s19, %s2781_s19   ;;  %s2126_s18 = sphi %s2170_s18, %s2780_s18   ;;  %s2122_s17 = sphi %s2168_s17, %s2779_s17   ;;  %s2118_s16 = sphi %s2166_s16, %s2778_s16   ;;  %s2114_s15 = sphi %s2164_s15, %s2777_s15  }
   0x5   : > { %s30_s23 = sadd.s32 1, %s2130_s19  ;;  %s147_s24 = sadd.s32 1, %s2122_s17 }
   0x6   : > { %p32_p0 = scmp.ge.s32.totalorder %s30_s23, 2  ;;  %p157_p1 = scmp.ne.s32.totalorder %s2122_s17, %s2118_s16 }
   0x7   : > { %p158_p2 = scmp.eq.s32.totalorder %s1539_s21, 1  ;;  %p163_p3 = scmp.ne.s32.totalorder %s2118_s16, %s2114_s15 }
   0x8   : > { %s2783_s23 = smov (%p32_p0, %s30_s23), 0  ;;  %p164_p5 = scmp.eq.s32.totalorder %s1540_s22, 1 }
   0x9   : > { %p2204_p4 = por %p158_p2, %p157_p1  ;;  %s142_s26 = ssub.s32 %s2130_s19, %s2783_s23 }
   0xa   : > { %p1543_p6 = scmp.ge.s32.totalorder %s2134_s20, 1  ;;  %p145_p7 = scmp.eq.s32.totalorder %s142_s26, 0 }
   0xb   : > { %p2211_p8 = por %p164_p5, %p163_p3  ;;  %p211_p9 = scmp.lt.s32.totalorder %s2134_s20, 3 }
   0xc   : > { %s2217_s28 = scalar_select %p145_p7, %s2122_s17, %s147_s24  }
   0xd   : > { %p212_p10 = pnand %p1543_p6, %p211_p9 }
   0xe   : > { %p261_p11 = scmp.lt.s32.totalorder (!%p212_p10), %s2126_s18, 1  ;;  %vm375_vm0 = vcmask (!%p212_p10), 261120   ;;  %s257_s22 = sand.u32 (!%p212_p10), 1, %s2118_s16  }
   0xf   : > { %215 = sbr.rel (%p212_p10) target bundleno = 861 (0x35d), region = 32  ;;  %s1544_s24 = sshll.u32 (!%p212_p10), %s257_s22, 8 }
  0x10   : > { %s2543_s26 = scalar_lea.vmem (!%p212_p10), [#allocation2], %s1544_s24  ;;  %s2653_s10 = scalar_lea.sflag (!%p212_p10), [#allocation3], %s257_s22 }
  0x11   : > { %s1399_s6 = sshll.u32 (!%p212_p10), %s2543_s26, 4  ;;  %s2649_s6 = int_to_ptr.vmem [resolvable:$true] %s1399_s6 }
  0x16   : > { %s2221_s29 = scalar_select %p261_p11, %s2126_s18, 1 }
  0x18   : > { %s1590_s30 = sshll.u32 %s2221_s29, 8  ;;  %s1591_s5 = sshll.u32 %s2221_s29, 5 }
  0x19   : > { %s2230_s8 = scalar_lea.vmem %s2770_s0, %s1590_s30  ;;  %s274_s11 = scalar_lea.vmem %s2771_s1, %s1591_s5 }
  0x1a   : > { %v355_v0 = vld [vmem:[%s274_s11] sm:$0xff]  ;;  %v356_v1 = vld [vmem:[%s274_s11 + $0x8] sm:$0xff]  ;;  %v357_v2 = vld [vmem:[%s274_s11 + $0x10] sm:$0xff]  ;;  %s1592_s12 = sshll.u32 %s2221_s29, 7  ;;  %s1594_s5 = sshll.u32 %s2126_s18, 12 }
  0x1b   : > { %v1815_v3 = vpack.c.bf16 %v356_v1, %v355_v0  ;;  %v358_v4 = vld [vmem:[%s274_s11 + $0x18] sm:$0xff]  ;;  %v291_v5 = vld [vmem:[%s2230_s8] sm:$0xff]  ;;  %v292_v8 = vld [vmem:[%s2230_s8 + $0x8] sm:$0xff]  ;;  %s2411_s21 = scalar_lea.vmem %s2772_s2, %s1592_s12  ;;  %s2647_s9 = scalar_lea.hbm %s2774_s4, %s1594_s5 }
  0x1c   : > { %v1819_v6 = vpack.c.bf16 %v358_v4, %v357_v2  ;;  %v323_v7 = vmul.f32 0.17677669, %v291_v5  ;;  %v293_v9 = vld [vmem:[%s2230_s8 + $0x10] sm:$0xff]  ;;  %v324_v10 = vmul.f32 0.17677669, %v292_v8  ;;  %v294_v12 = vld [vmem:[%s2230_s8 + $0x18] sm:$0xff] }
  0x1d   : > { %1816 = vmatprep.subr.bf16.mxu0 %v1815_v3  ;;  %v325_v11 = vmul.f32 0.17677669, %v293_v9  ;;  %v295_v13 = vld [vmem:[%s2230_s8 + $0x20] sm:$0xff]  ;;  %v326_v14 = vmul.f32 0.17677669, %v294_v12  ;;  %v296_v16 = vld [vmem:[%s2230_s8 + $0x28] sm:$0xff] }
  0x1e   : > { %1818 = vmatpush3.bf16.msra.mxu0 %v1815_v3  ;;  %1687 = vmatprep.mubr.msk.f32.mxu0 %vm375_vm0, %v323_v7  ;;  %v327_v15 = vmul.f32 0.17677669, %v295_v13  ;;  %v297_v17 = vld [vmem:[%s2230_s8 + $0x30] sm:$0xff]  ;;  %v328_v18 = vmul.f32 0.17677669, %v296_v16  ;;  %v298_v20 = vld [vmem:[%s2230_s8 + $0x38] sm:$0xff] }
  0x1f   : > { %1820 = vmatprep.subr.bf16.mxu0 %v1819_v6  ;;  %v329_v19 = vmul.f32 0.17677669, %v297_v17  ;;  %v299_v21 = vld [vmem:[%s2230_s8 + $0x40] sm:$0xff]  ;;  %v330_v22 = vmul.f32 0.17677669, %v298_v20  ;;  %v300_v24 = vld [vmem:[%s2230_s8 + $0x48] sm:$0xff] }
  0x20   : > { %v331_v23 = vmul.f32 0.17677669, %v299_v21  ;;  %v301_v25 = vld [vmem:[%s2230_s8 + $0x50] sm:$0xff]  ;;  %v332_v26 = vmul.f32 0.17677669, %v300_v24  ;;  %v302_v28 = vld [vmem:[%s2230_s8 + $0x58] sm:$0xff] }
  0x21   : > { %v333_v27 = vmul.f32 0.17677669, %v301_v25  ;;  %v303_v29 = vld [vmem:[%s2230_s8 + $0x60] sm:$0xff]  ;;  %v334_v30 = vmul.f32 0.17677669, %v302_v28  ;;  %v304_v32 = vld [vmem:[%s2230_s8 + $0x68] sm:$0xff] }
  0x22   : > { %1822 = vmatpush3.bf16.msra.mxu0 %v1819_v6  ;;  %v335_v31 = vmul.f32 0.17677669, %v303_v29  ;;  %v305_v33 = vld [vmem:[%s2230_s8 + $0x70] sm:$0xff]  ;;  %v336_v34 = vmul.f32 0.17677669, %v304_v32  ;;  %v306_v36 = vld [vmem:[%s2230_s8 + $0x78] sm:$0xff] }
  0x23   : > { %v337_v35 = vmul.f32 0.17677669, %v305_v33  ;;  %v307_v37 = vld [vmem:[%s2230_s8 + $0x80] sm:$0xff]  ;;  %v338_v38 = vmul.f32 0.17677669, %v306_v36  ;;  %v308_v40 = vld [vmem:[%s2230_s8 + $0x88] sm:$0xff] }
  0x24   : > { %v339_v39 = vmul.f32 0.17677669, %v307_v37  ;;  %v309_v41 = vld [vmem:[%s2230_s8 + $0x90] sm:$0xff]  ;;  %v340_v42 = vmul.f32 0.17677669, %v308_v40  ;;  %v310_v44 = vld [vmem:[%s2230_s8 + $0x98] sm:$0xff] }
  0x25   : > { %1688 = vmatmul.mubr.msk.f32.vlgmr.msra.gmra.mrb[0].mxu0 %vm375_vm0, %v324_v10  ;;  %v341_v43 = vmul.f32 0.17677669, %v309_v41  ;;  %v311_v45 = vld [vmem:[%s2230_s8 + $0xa0] sm:$0xff]  ;;  %v342_v46 = vmul.f32 0.17677669, %v310_v44  ;;  %v312_v48 = vld [vmem:[%s2230_s8 + $0xa8] sm:$0xff] }
  0x26   : > { %1690 = vmatprep.mubr.msk.f32.mxu0 %vm375_vm0, %v325_v11  ;;  %v343_v47 = vmul.f32 0.17677669, %v311_v45  ;;  %v313_v49 = vld [vmem:[%s2230_s8 + $0xb0] sm:$0xff]  ;;  %v344_v50 = vmul.f32 0.17677669, %v312_v48  ;;  %v314_v52 = vld [vmem:[%s2230_s8 + $0xb8] sm:$0xff] }
  0x27   : > { %v345_v51 = vmul.f32 0.17677669, %v313_v49  ;;  %v315_v53 = vld [vmem:[%s2230_s8 + $0xc0] sm:$0xff]  ;;  %v346_v54 = vmul.f32 0.17677669, %v314_v52  ;;  %v316_v56 = vld [vmem:[%s2230_s8 + $0xc8] sm:$0xff] }
  0x28   : > { %v347_v55 = vmul.f32 0.17677669, %v315_v53  ;;  %v317_v57 = vld [vmem:[%s2230_s8 + $0xd0] sm:$0xff]  ;;  %v348_v58 = vmul.f32 0.17677669, %v316_v56  ;;  %v318_v60 = vld [vmem:[%s2230_s8 + $0xd8] sm:$0xff] }
  0x29   : > { %1691 = vmatmul.mubr.msk.f32.gmra.mrb[2].mxu0 %vm375_vm0, %v326_v14  ;;  %v349_v59 = vmul.f32 0.17677669, %v317_v57  ;;  %v319_v61 = vld [vmem:[%s2230_s8 + $0xe0] sm:$0xff]  ;;  %v350_v62 = vmul.f32 0.17677669, %v318_v60  ;;  %v320_v0 = vld [vmem:[%s2230_s8 + $0xe8] sm:$0xff] }
  0x2a   : > { %1693 = vmatprep.mubr.msk.f32.mxu0 %vm375_vm0, %v327_v15  ;;  %v351_v63 = vmul.f32 0.17677669, %v319_v61  ;;  %v321_v1 = vld [vmem:[%s2230_s8 + $0xf0] sm:$0xff]  ;;  %v352_v2 = vmul.f32 0.17677669, %v320_v0  ;;  %v322_v4 = vld [vmem:[%s2230_s8 + $0xf8] sm:$0xff] }
  0x2b   : > { %v353_v3 = vmul.f32 0.17677669, %v321_v1  ;;  %v354_v5 = vmul.f32 0.17677669, %v322_v4  ;;  %s2056_s11 = scalar_lea.vmem %s2649_s6, 4096  ;;  %s2136_s18 = smov [#allocation2]  }
  0x2c   : > { %p2057_p12 = scmp.ne.s32.totalorder %s2649_s6, %s2056_s11  ;;  %s2060_s12 = sshll.u32 %s2136_s18, 4  ;;  %s2061_s12 = int_to_ptr.vmem [resolvable:$false] %s2060_s12 }
  0x2d   : > { %1694 = vmatmul.mubr.msk.f32.gmra.mrb[4].mxu0 %vm375_vm0, %v328_v18  ;;  %s2062_s13 = scalar_lea.vmem %s2061_s12, 8192  ;;  %p2063_p1 = scmp.lt.s32.totalorder %s2649_s6, %s2061_s12 }
  0x2e   : > { %1696 = vmatprep.mubr.msk.f32.mxu0 %vm375_vm0, %v329_v19  ;;  %p2058_p13 = pnand %p2057_p12, %p2204_p4  ;;  %p2064_p2 = scmp.lt.s32.totalorder %s2062_s13, %s2056_s11 }
  0x30   : > { %p2059_p0 = pneg %p2058_p13  ;;  %p2065_p3 = por %p2064_p2, %p2063_p1 }
  0x31   : > { %1697 = vmatmul.mubr.msk.f32.gmra.mrb[6].mxu0 %vm375_vm0, %v330_v22 }
  0x32   : > { %1699 = vmatprep.mubr.msk.f32.mxu0 %vm375_vm0, %v331_v23  ;;  %p2066_p5 = pnand %p2065_p3, %p2059_p0 }
  0x35   : > { %1700 = vmatmul.mubr.msk.f32.gmra.mrb[8].mxu0 %vm375_vm0, %v332_v26 }
  0x36   : > { %1702 = vmatprep.mubr.msk.f32.mxu0 %vm375_vm0, %v333_v27 }
  0x39   : > { %1703 = vmatmul.mubr.msk.f32.gmra.mrb[10].mxu0 %vm375_vm0, %v334_v30 }
  0x3a   : > { %1705 = vmatprep.mubr.msk.f32.mxu0 %vm375_vm0, %v335_v31 }
  0x3d   : > { %1706 = vmatmul.mubr.msk.f32.gmra.mrb[12].mxu0 %vm375_vm0, %v336_v34 }
  0x3e   : > { %1708 = vmatprep.mubr.msk.f32.mxu0 %vm375_vm0, %v337_v35 }
  0x41   : > { %1709 = vmatmul.mubr.msk.f32.gmra.mrb[14].mxu0 %vm375_vm0, %v338_v38 }
  0x42   : > { %1711 = vmatprep.mubr.msk.f32.mxu0 %vm375_vm0, %v339_v39 }
  0x45   : > { %1712 = vmatmul.mubr.msk.f32.gmra.mrb[16].mxu0 %vm375_vm0, %v340_v42 }
  0x46   : > { %1714 = vmatprep.mubr.msk.f32.mxu0 %vm375_vm0, %v341_v43 }
  0x49   : > { %1715 = vmatmul.mubr.msk.f32.gmra.mrb[18].mxu0 %vm375_vm0, %v342_v46 }
  0x4a   : > { %1717 = vmatprep.mubr.msk.f32.mxu0 %vm375_vm0, %v343_v47 }
  0x4d   : > { %1718 = vmatmul.mubr.msk.f32.gmra.mrb[20].mxu0 %vm375_vm0, %v344_v50 }
  0x4e   : > { %1720 = vmatprep.mubr.msk.f32.mxu0 %vm375_vm0, %v345_v51 }
  0x51   : > { %1721 = vmatmul.mubr.msk.f32.gmra.mrb[22].mxu0 %vm375_vm0, %v346_v54 }
  0x52   : > { %1723 = vmatprep.mubr.msk.f32.mxu0 %vm375_vm0, %v347_v55 }
  0x55   : > { %1724 = vmatmul.mubr.msk.f32.gmra.mrb[24].mxu0 %vm375_vm0, %v348_v58 }
  0x56   : > { %1726 = vmatprep.mubr.msk.f32.mxu0 %vm375_vm0, %v349_v59 }
  0x59   : > { %1727 = vmatmul.mubr.msk.f32.gmra.mrb[26].mxu0 %vm375_vm0, %v350_v62 }
  0x5a   : > { %1729 = vmatprep.mubr.msk.f32.mxu0 %vm375_vm0, %v351_v63 }
  0x5d   : > { %1730 = vmatmul.mubr.msk.f32.gmra.mrb[28].mxu0 %vm375_vm0, %v352_v2 }
  0x5e   : > { %1732 = vmatprep.mubr.msk.f32.mxu0 %vm375_vm0, %v353_v3 }
  0x61   : > { %1733 = vmatmul.mubr.msk.f32.gmra.mrb[30].mxu0 %vm375_vm0, %v354_v5 }
  0xf8   : > { %v2299_v6 = vpop.f32.mrb[0].mxu0 }
  0xf9   : > { %v2301_v7 = vpop.f32.mrb[1].mxu0 }
  0xfa   : > { %697 = vmax.xlane.f32.xlu0 %v2301_v7 }
  0xfc   : > { %v2304_v8 = vpop.f32.mrb[2].mxu0 }
  0xfd   : > { %v2306_v9 = vpop.f32.mrb[3].mxu0 }
 0x100   : > { %v2308_v10 = vpop.f32.mrb[4].mxu0 }
 0x101   : > { %v2310_v11 = vpop.f32.mrb[5].mxu0 }
 0x104   : > { %v1698_v12 = vpop.f32.mrb[6].mxu0 }
 0x105   : > { %711 = vmax.xlane.f32.xlu0 %v1698_v12  ;;  %v2312_v13 = vpop.f32.mrb[7].mxu0 }
 0x108   : > { %v1701_v14 = vpop.f32.mrb[8].mxu0 }
 0x109   : > { %709 = vmax.xlane.f32.xlu0 %v2312_v13  ;;  %715 = vmax.xlane.f32.xlu1 %v1701_v14  ;;  %v2315_v15 = vpop.f32.mrb[9].mxu0 }
 0x10c   : > { %v2317_v16 = vpop.f32.mrb[10].mxu0 }
 0x10d   : > { %699 = vmax.xlane.f32.xlu0 %v2299_v6  ;;  %713 = vmax.xlane.f32.xlu1 %v2315_v15  ;;  %v2321_v17 = vpop.f32.mrb[11].mxu0 }
 0x110   : > { %v2323_v18 = vpop.f32.mrb[12].mxu0 }
 0x111   : > { %719 = vmax.xlane.f32.xlu1 %v2317_v16  ;;  %717 = vmax.xlane.f32.xlu0 %v2321_v17  ;;  %v2327_v19 = vpop.f32.mrb[13].mxu0 }
 0x114   : > { %v2329_v20 = vpop.f32.mrb[14].mxu0 }
 0x115   : > { %723 = vmax.xlane.f32.xlu1 %v2323_v18  ;;  %721 = vmax.xlane.f32.xlu0 %v2327_v19  ;;  %v2333_v21 = vpop.f32.mrb[15].mxu0 }
 0x118   : > { %v2335_v22 = vpop.f32.mrb[16].mxu0 }
 0x119   : > { %727 = vmax.xlane.f32.xlu1 %v2329_v20  ;;  %725 = vmax.xlane.f32.xlu0 %v2333_v21  ;;  %v2339_v23 = vpop.f32.mrb[17].mxu0 }
 0x11c   : > { %v2341_v24 = vpop.f32.mrb[18].mxu0 }
 0x11d   : > { %731 = vmax.xlane.f32.xlu1 %v2335_v22  ;;  %729 = vmax.xlane.f32.xlu0 %v2339_v23  ;;  %v2345_v25 = vpop.f32.mrb[19].mxu0 }
 0x120   : > { %v2347_v26 = vpop.f32.mrb[20].mxu0 }
 0x121   : > { %735 = vmax.xlane.f32.xlu1 %v2341_v24  ;;  %733 = vmax.xlane.f32.xlu0 %v2345_v25  ;;  %v2351_v27 = vpop.f32.mrb[21].mxu0 }
 0x124   : > { %v2353_v28 = vpop.f32.mrb[22].mxu0 }
 0x125   : > { %739 = vmax.xlane.f32.xlu1 %v2347_v26  ;;  %737 = vmax.xlane.f32.xlu0 %v2351_v27  ;;  %v2357_v29 = vpop.f32.mrb[23].mxu0 }
 0x128   : > { %v2359_v30 = vpop.f32.mrb[24].mxu0 }
 0x129   : > { %743 = vmax.xlane.f32.xlu1 %v2353_v28  ;;  %741 = vmax.xlane.f32.xlu0 %v2357_v29  ;;  %v2363_v31 = vpop.f32.mrb[25].mxu0 }
 0x12c   : > { %v2365_v32 = vpop.f32.mrb[26].mxu0 }
 0x12d   : > { %747 = vmax.xlane.f32.xlu1 %v2359_v30  ;;  %745 = vmax.xlane.f32.xlu0 %v2363_v31  ;;  %v2369_v33 = vpop.f32.mrb[27].mxu0 }
 0x130   : > { %v2371_v34 = vpop.f32.mrb[28].mxu0 }
 0x131   : > { %701 = vmax.xlane.f32.xlu0 %v2306_v9  ;;  %751 = vmax.xlane.f32.xlu1 %v2365_v32  ;;  %v2375_v35 = vpop.f32.mrb[29].mxu0 }
 0x134   : > { %v2377_v36 = vpop.f32.mrb[30].mxu0 }
 0x135   : > { %703 = vmax.xlane.f32.xlu0 %v2304_v8  ;;  %749 = vmax.xlane.f32.xlu1 %v2369_v33  ;;  %v2381_v37 = vpop.f32.mrb[31].mxu0 }
 0x139   : > { %705 = vmax.xlane.f32.xlu0 %v2310_v11  ;;  %755 = vmax.xlane.f32.xlu1 %v2371_v34 }
 0x13d   : > { %707 = vmax.xlane.f32.xlu0 %v2308_v10  ;;  %753 = vmax.xlane.f32.xlu1 %v2375_v35 }
 0x141   : > { %757 = vmax.xlane.f32.xlu1 %v2381_v37 }
 0x145   : > { %759 = vmax.xlane.f32.xlu1 %v2377_v36 }
 0x187   : > { %v698_v38 = vpop.xlane.xlu0 %697 }
 0x188   : > { %v761_v46 = vsub.f32 %v2301_v7, %v698_v38 }
 0x18a   : > { %v793_v51 = vmul.f32 1.442695, %v761_v46 }
 0x192   : > { %v712_v39 = vpop.xlane.xlu0 %711 }
 0x193   : > { %v768_v40 = vsub.f32 %v1698_v12, %v712_v39 }
 0x195   : > { %v807_v41 = vmul.f32 1.442695, %v768_v40 }
 0x196   : > { %v710_v42 = vpop.xlane.xlu0 %709  ;;  %v716_v43 = vpop.xlane.xlu1 %715 }
 0x197   : > { %1928 = vpow2.f32 %v807_v41  ;;  %v770_v44 = vsub.f32 %v1701_v14, %v716_v43  ;;  %v767_v52 = vsub.f32 %v2312_v13, %v710_v42  ;;  %v359_v41 = vld [vmem:[%s2411_s21] sm:$0xff]  ;;  %v360_v42 = vld [vmem:[%s2411_s21 + $0x8] sm:$0xff] }
 0x198   : > { %v1823_v43 = vpack.c.bf16 %v360_v42, %v359_v41 }
 0x199   : > { %v811_v45 = vmul.f32 1.442695, %v770_v44  ;;  %v805_v58 = vmul.f32 1.442695, %v767_v52 }
 0x19a   : > { %v700_v47 = vpop.xlane.xlu0 %699  ;;  %v714_v48 = vpop.xlane.xlu1 %713  ;;  %1824 = vmatprep.subr.bf16.mxu0 %v1823_v43  ;;  %1855 = vmatprep.subr.bf16.mxu1 %v1823_v43 }
 0x19b   : > { %v762_v49 = vsub.f32 %v2299_v6, %v700_v47  ;;  %1930 = vpow2.f32 %v811_v45  ;;  %v769_v59 = vsub.f32 %v2315_v15, %v714_v48  ;;  %1826 = vmatpush3.bf16.msra.mxu0 %v1823_v43  ;;  %1863 = vmatpush3.bf16.msra.mxu1 %v1823_v43 }
 0x19d   : > { %v795_v50 = vmul.f32 1.442695, %v762_v49  ;;  %v809_v1 = vmul.f32 1.442695, %v769_v59 }
 0x19e   : > { %v720_v53 = vpop.xlane.xlu1 %719  ;;  %v718_v54 = vpop.xlane.xlu0 %717 }
 0x19f   : > { %1932 = vpow2.f32 %v795_v50  ;;  %v772_v55 = vsub.f32 %v2317_v16, %v720_v53  ;;  %v771_v2 = vsub.f32 %v2321_v17, %v718_v54  ;;  %v361_v50 = vld [vmem:[%s2411_s21 + $0x10] sm:$0xff] }
 0x1a0   : > { %1934 = vpow2.f32 %v793_v51 }
 0x1a1   : > { %v2393_v56 = vpop.eup %1928  ;;  %v815_v57 = vmul.f32 1.442695, %v772_v55  ;;  %v813_v12 = vmul.f32 1.442695, %v771_v2 }
 0x1a2   : > { %v724_v60 = vpop.xlane.xlu1 %723  ;;  %v722_v61 = vpop.xlane.xlu0 %721  ;;  %871 = vadd.xlane.f32.xlu1 %v2393_v56 }
 0x1a3   : > { %1936 = vpow2.f32 %v815_v57  ;;  %v774_v62 = vsub.f32 %v2323_v18, %v724_v60  ;;  %v773_v13 = vsub.f32 %v2327_v19, %v722_v61  ;;  %v364_v60 = vld [vmem:[%s2411_s21 + $0x28] sm:$0xff] }
 0x1a4   : > { %1938 = vpow2.f32 %v805_v58 }
 0x1a5   : > { %v819_v63 = vmul.f32 1.442695, %v774_v62  ;;  %v2398_v0 = vpop.eup %1930  ;;  %v817_v19 = vmul.f32 1.442695, %v773_v13 }
 0x1a6   : > { %v728_v3 = vpop.xlane.xlu1 %727  ;;  %v726_v4 = vpop.xlane.xlu0 %725  ;;  %875 = vadd.xlane.f32.xlu1 %v2398_v0 }
 0x1a7   : > { %1940 = vpow2.f32 %v819_v63  ;;  %v776_v5 = vsub.f32 %v2329_v20, %v728_v3  ;;  %v775_v38 = vsub.f32 %v2333_v21, %v726_v4 }
 0x1a8   : > { %1942 = vpow2.f32 %v809_v1 }
 0x1a9   : > { %v2404_v6 = vpop.eup %1932  ;;  %v823_v7 = vmul.f32 1.442695, %v776_v5  ;;  %v821_v21 = vmul.f32 1.442695, %v775_v38  ;;  %v366_v5 = vld [vmem:[%s2411_s21 + $0x38] sm:$0xff]  ;;  %v368_v38 = vld [vmem:[%s2411_s21 + $0x48] sm:$0xff] }
 0x1aa   : > { %v732_v14 = vpop.xlane.xlu1 %731  ;;  %v730_v15 = vpop.xlane.xlu0 %729  ;;  %859 = vadd.xlane.f32.xlu0 %v2404_v6 }
 0x1ab   : > { %1944 = vpow2.f32 %v823_v7  ;;  %v778_v16 = vsub.f32 %v2335_v22, %v732_v14  ;;  %v2414_v17 = vpop.eup %1934  ;;  %v777_v47 = vsub.f32 %v2339_v23, %v730_v15 }
 0x1ac   : > { %1946 = vpow2.f32 %v813_v12 }
 0x1ad   : > { %v2416_v18 = vpop.eup %1936  ;;  %v827_v20 = vmul.f32 1.442695, %v778_v16  ;;  %v825_v55 = vmul.f32 1.442695, %v777_v47  ;;  %v370_v47 = vld [vmem:[%s2411_s21 + $0x58] sm:$0xff] }
 0x1ae   : > { %v736_v39 = vpop.xlane.xlu1 %735  ;;  %v734_v40 = vpop.xlane.xlu0 %733  ;;  %857 = vadd.xlane.f32.xlu0 %v2414_v17  ;;  %879 = vadd.xlane.f32.xlu1 %v2416_v18 }
 0x1af   : > { %1948 = vpow2.f32 %v827_v20  ;;  %v780_v22 = vsub.f32 %v2341_v24, %v736_v39  ;;  %v2424_v44 = vpop.eup %1938  ;;  %v362_v24 = vld [vmem:[%s2411_s21 + $0x18] sm:$0xff]  ;;  %v779_v57 = vsub.f32 %v2345_v25, %v734_v40 }
 0x1b0   : > { %1950 = vpow2.f32 %v817_v19  ;;  %v1827_v52 = vpack.c.bf16 %v362_v24, %v361_v50 }
 0x1b1   : > { %v2426_v45 = vpop.eup %1940  ;;  %v831_v46 = vmul.f32 1.442695, %v780_v22  ;;  %v829_v2 = vmul.f32 1.442695, %v779_v57 }
 0x1b2   : > { %v740_v48 = vpop.xlane.xlu1 %739  ;;  %v738_v49 = vpop.xlane.xlu0 %737  ;;  %869 = vadd.xlane.f32.xlu0 %v2424_v44  ;;  %883 = vadd.xlane.f32.xlu1 %v2426_v45 }
 0x1b3   : > { %1952 = vpow2.f32 %v831_v46  ;;  %v782_v51 = vsub.f32 %v2347_v26, %v740_v48  ;;  %v2434_v53 = vpop.eup %1942  ;;  %1828 = vmatprep.subr.bf16.mxu0 %v1827_v52  ;;  %1856 = vmatprep.subr.bf16.mxu1 %v1827_v52  ;;  %v363_v26 = vld [vmem:[%s2411_s21 + $0x20] sm:$0xff]  ;;  %v781_v7 = vsub.f32 %v2351_v27, %v738_v49 }
 0x1b4   : > { %1954 = vpow2.f32 %v821_v21  ;;  %1830 = vmatpush3.bf16.msra.mxu0 %v1827_v52  ;;  %v1831_v62 = vpack.c.bf16 %v364_v60, %v363_v26  ;;  %1864 = vmatpush3.bf16.msra.mxu1 %v1827_v52  ;;  %v369_v21 = vld [vmem:[%s2411_s21 + $0x50] sm:$0xff] }
 0x1b5   : > { %v2436_v54 = vpop.eup %1944  ;;  %v835_v23 = vmul.f32 1.442695, %v782_v51  ;;  %v833_v39 = vmul.f32 1.442695, %v781_v7  ;;  %v1843_v49 = vpack.c.bf16 %v370_v47, %v369_v21 }
 0x1b6   : > { %v744_v58 = vpop.xlane.xlu1 %743  ;;  %v742_v59 = vpop.xlane.xlu0 %741  ;;  %873 = vadd.xlane.f32.xlu0 %v2434_v53  ;;  %887 = vadd.xlane.f32.xlu1 %v2436_v54 }
 0x1b7   : > { %1956 = vpow2.f32 %v835_v23  ;;  %v784_v61 = vsub.f32 %v2353_v28, %v744_v58  ;;  %v2444_v63 = vpop.eup %1946  ;;  %1832 = vmatprep.subr.bf16.mxu0 %v1831_v62  ;;  %1857 = vmatprep.subr.bf16.mxu1 %v1831_v62  ;;  %v365_v28 = vld [vmem:[%s2411_s21 + $0x30] sm:$0xff]  ;;  %v783_v20 = vsub.f32 %v2357_v29, %v742_v59  ;;  %v372_v23 = vld [vmem:[%s2411_s21 + $0x68] sm:$0xff] }
 0x1b8   : > { %1958 = vpow2.f32 %v825_v55  ;;  %1834 = vmatpush3.bf16.msra.mxu0 %v1831_v62  ;;  %v1835_v13 = vpack.c.bf16 %v366_v5, %v365_v28  ;;  %1865 = vmatpush3.bf16.msra.mxu1 %v1831_v62 }
 0x1b9   : > { %v2446_v1 = vpop.eup %1948  ;;  %v839_v25 = vmul.f32 1.442695, %v784_v61  ;;  %v837_v43 = vmul.f32 1.442695, %v783_v20 }
 0x1ba   : > { %v748_v3 = vpop.xlane.xlu1 %747  ;;  %877 = vadd.xlane.f32.xlu0 %v2444_v63  ;;  %v746_v4 = vpop.xlane.xlu0 %745  ;;  %891 = vadd.xlane.f32.xlu1 %v2446_v1 }
 0x1bb   : > { %1960 = vpow2.f32 %v839_v25  ;;  %v786_v12 = vsub.f32 %v2359_v30, %v748_v3  ;;  %v2454_v14 = vpop.eup %1950  ;;  %1836 = vmatprep.subr.bf16.mxu0 %v1835_v13  ;;  %1858 = vmatprep.subr.bf16.mxu1 %v1835_v13  ;;  %v367_v30 = vld [vmem:[%s2411_s21 + $0x40] sm:$0xff] }
 0x1bc   : > { %1962 = vpow2.f32 %v829_v2  ;;  %1838 = vmatpush3.bf16.msra.mxu0 %v1835_v13  ;;  %v1839_v41 = vpack.c.bf16 %v368_v38, %v367_v30  ;;  %1866 = vmatpush3.bf16.msra.mxu1 %v1835_v13  ;;  %v374_v2 = vld [vmem:[%s2411_s21 + $0x78] sm:$0xff] }
 0x1bd   : > { %v2456_v15 = vpop.eup %1952  ;;  %v843_v16 = vmul.f32 1.442695, %v786_v12 }
 0x1be   : > { %881 = vadd.xlane.f32.xlu0 %v2454_v14  ;;  %v702_v27 = vpop.xlane.xlu0 %701  ;;  %v752_v19 = vpop.xlane.xlu1 %751  ;;  %895 = vadd.xlane.f32.xlu1 %v2456_v15 }
 0x1bf   : > { %1964 = vpow2.f32 %v843_v16  ;;  %v788_v40 = vsub.f32 %v2365_v32, %v752_v19  ;;  %v2464_v42 = vpop.eup %1954  ;;  %1840 = vmatprep.subr.bf16.mxu0 %v1839_v41  ;;  %1859 = vmatprep.subr.bf16.mxu1 %v1839_v41  ;;  %v785_v32 = vsub.f32 %v2363_v31, %v746_v4  ;;  %v763_v57 = vsub.f32 %v2306_v9, %v702_v27 }
 0x1c0   : > { %1966 = vpow2.f32 %v833_v39  ;;  %1842 = vmatpush3.bf16.msra.mxu0 %v1839_v41  ;;  %1867 = vmatpush3.bf16.msra.mxu1 %v1839_v41 }
 0x1c1   : > { %v2466_v29 = vpop.eup %1956  ;;  %v847_v22 = vmul.f32 1.442695, %v788_v40  ;;  %1844 = vmatprep.subr.bf16.mxu0 %v1843_v49  ;;  %1860 = vmatprep.subr.bf16.mxu1 %v1843_v49  ;;  %v841_v55 = vmul.f32 1.442695, %v785_v32  ;;  %v797_v3 = vmul.f32 1.442695, %v763_v57 }
 0x1c2   : > { %885 = vadd.xlane.f32.xlu0 %v2464_v42  ;;  %v750_v46 = vpop.xlane.xlu1 %749  ;;  %899 = vadd.xlane.f32.xlu1 %v2466_v29  ;;  %v2474_v50 = vpop.eup %1958 }
 0x1c3   : > { %v787_v48 = vsub.f32 %v2369_v33, %v750_v46  ;;  %1968 = vpow2.f32 %v847_v22  ;;  %v704_v24 = vpop.xlane.xlu0 %703  ;;  %v371_v33 = vld [vmem:[%s2411_s21 + $0x60] sm:$0xff] }
 0x1c4   : > { %1970 = vpow2.f32 %v837_v43  ;;  %1846 = vmatpush3.bf16.msra.mxu0 %v1843_v49  ;;  %v1847_v59 = vpack.c.bf16 %v372_v23, %v371_v33  ;;  %1868 = vmatpush3.bf16.msra.mxu1 %v1843_v49  ;;  %v764_v62 = vsub.f32 %v2304_v8, %v704_v24 }
 0x1c5   : > { %v2476_v51 = vpop.eup %1960  ;;  %v845_v52 = vmul.f32 1.442695, %v787_v48 }
 0x1c6   : > { %889 = vadd.xlane.f32.xlu0 %v2474_v50  ;;  %v756_v31 = vpop.xlane.xlu1 %755  ;;  %903 = vadd.xlane.f32.xlu1 %v2476_v51  ;;  %v2484_v26 = vpop.eup %1962  ;;  %v799_v12 = vmul.f32 1.442695, %v764_v62 }
 0x1c7   : > { %v790_v58 = vsub.f32 %v2371_v34, %v756_v31  ;;  %1972 = vpow2.f32 %v845_v52  ;;  %1848 = vmatprep.subr.bf16.mxu0 %v1847_v59  ;;  %1861 = vmatprep.subr.bf16.mxu1 %v1847_v59  ;;  %v706_v25 = vpop.xlane.xlu0 %705  ;;  %v373_v34 = vld [vmem:[%s2411_s21 + $0x70] sm:$0xff] }
 0x1c8   : > { %1974 = vpow2.f32 %v841_v55  ;;  %1850 = vmatpush3.bf16.msra.mxu0 %v1847_v59  ;;  %v1851_v28 = vpack.c.bf16 %v374_v2, %v373_v34  ;;  %1869 = vmatpush3.bf16.msra.mxu1 %v1847_v59  ;;  %v765_v13 = vsub.f32 %v2310_v11, %v706_v25 }
 0x1c9   : > { %v2486_v60 = vpop.eup %1964  ;;  %v851_v61 = vmul.f32 1.442695, %v790_v58 }
 0x1ca   : > { %893 = vadd.xlane.f32.xlu0 %v2484_v26  ;;  %v754_v9 = vpop.xlane.xlu1 %753  ;;  %907 = vadd.xlane.f32.xlu1 %v2486_v60  ;;  %v2494_v5 = vpop.eup %1966  ;;  %v801_v38 = vmul.f32 1.442695, %v765_v13 }
 0x1cb   : > { %v789_v4 = vsub.f32 %v2375_v35, %v754_v9  ;;  %1976 = vpow2.f32 %v851_v61  ;;  %1852 = vmatprep.subr.bf16.mxu0 %v1851_v28  ;;  %1862 = vmatprep.subr.bf16.mxu1 %v1851_v28  ;;  %v708_v27 = vpop.xlane.xlu0 %707 }
 0x1cc   : > { %1978 = vpow2.f32 %v797_v3  ;;  %1854 = vmatpush3.bf16.msra.mxu0 %v1851_v28  ;;  %1870 = vmatpush3.bf16.msra.mxu1 %v1851_v28  ;;  %v766_v39 = vsub.f32 %v2308_v10, %v708_v27 }
 0x1cd   : > { %v849_v7 = vmul.f32 1.442695, %v789_v4  ;;  %v2496_v8 = vpop.eup %1968 }
 0x1ce   : > { %897 = vadd.xlane.f32.xlu0 %v2494_v5  ;;  %v758_v16 = vpop.xlane.xlu1 %757  ;;  %911 = vadd.xlane.f32.xlu1 %v2496_v8  ;;  %v2502_v20 = vpop.eup %1970  ;;  %v803_v43 = vmul.f32 1.442695, %v766_v39 }
 0x1cf   : > { %v791_v35 = vsub.f32 %v2381_v37, %v758_v16  ;;  %1980 = vpow2.f32 %v849_v7 }
 0x1d0   : > { %1982 = vpow2.f32 %v799_v12 }
 0x1d1   : > { %v853_v19 = vmul.f32 1.442695, %v791_v35  ;;  %v2504_v30 = vpop.eup %1972 }
 0x1d2   : > { %901 = vadd.xlane.f32.xlu0 %v2502_v20  ;;  %v760_v11 = vpop.xlane.xlu1 %759  ;;  %909 = vadd.xlane.f32.xlu1 %v2504_v30  ;;  %v2510_v40 = vpop.eup %1974 }
 0x1d3   : > { %1984 = vpow2.f32 %v853_v19  ;;  %v792_v37 = vsub.f32 %v2377_v36, %v760_v11 }
 0x1d4   : > { %1986 = vpow2.f32 %v801_v38 }
 0x1d5   : > { %v855_v41 = vmul.f32 1.442695, %v792_v37  ;;  %v2512_v22 = vpop.eup %1976 }
 0x1d6   : > { %905 = vadd.xlane.f32.xlu0 %v2510_v40  ;;  %915 = vadd.xlane.f32.xlu1 %v2512_v22  ;;  %v2516_v46 = vpop.eup %1978 }
 0x1d7   : > { %1988 = vpow2.f32 %v855_v41 }
 0x1d8   : > { %1990 = vpow2.f32 %v803_v43 }
 0x1d9   : > { %v2518_v10 = vpop.eup %1980 }
 0x1da   : > { %861 = vadd.xlane.f32.xlu0 %v2516_v46  ;;  %913 = vadd.xlane.f32.xlu1 %v2518_v10  ;;  %v2522_v36 = vpop.eup %1982 }
 0x1dd   : > { %v2524_v21 = vpop.eup %1984 }
 0x1de   : > { %863 = vadd.xlane.f32.xlu0 %v2522_v36  ;;  %917 = vadd.xlane.f32.xlu1 %v2524_v21  ;;  %v2528_v47 = vpop.eup %1986 }
 0x1e1   : > { %v2530_v32 = vpop.eup %1988 }
 0x1e2   : > { %865 = vadd.xlane.f32.xlu0 %v2528_v47  ;;  %919 = vadd.xlane.f32.xlu1 %v2530_v32  ;;  %v2534_v48 = vpop.eup %1990 }
 0x1e6   : > { %867 = vadd.xlane.f32.xlu0 %v2534_v48 }
 0x22f   : > { %v872_v49 = vpop.xlane.xlu1 %871 }
 0x230   : > { %1992 = vrcp.f32 %v872_v49 }
 0x233   : > { %v876_v24 = vpop.xlane.xlu1 %875 }
 0x234   : > { %1994 = vrcp.f32 %v876_v24 }
 0x237   : > { %v860_v52 = vpop.xlane.xlu0 %859 }
 0x238   : > { %1996 = vrcp.f32 %v860_v52 }
 0x23a   : > { %v1993_v31 = vpop.eup %1992 }
 0x23b   : > { %v960_v33 = vmul.f32 %v1993_v31, %v872_v49  ;;  %v858_v23 = vpop.xlane.xlu0 %857  ;;  %v880_v55 = vpop.xlane.xlu1 %879 }
 0x23c   : > { %1998 = vrcp.f32 %v858_v23 }
 0x23d   : > { %v992_v57 = vsub.f32 2.0, %v960_v33  ;;  %2000 = vrcp.f32 %v880_v55 }
 0x23e   : > { %v1995_v58 = vpop.eup %1994 }
 0x23f   : > { %v1024_v59 = vmul.f32 %v1993_v31, %v992_v57  ;;  %v870_v61 = vpop.xlane.xlu0 %869  ;;  %v884_v62 = vpop.xlane.xlu1 %883  ;;  %v962_v25 = vmul.f32 %v1995_v58, %v876_v24 }
 0x240   : > { %2002 = vrcp.f32 %v870_v61 }
 0x241   : > { %2004 = vrcp.f32 %v884_v62  ;;  %v2541_v9 = vmul.f32 %v2393_v56, %v1024_v59  ;;  %v994_v2 = vsub.f32 2.0, %v962_v25 }
 0x242   : > { %v1997_v34 = vpop.eup %1996 }
 0x243   : > { %v954_v3 = vmul.f32 %v1997_v34, %v860_v52  ;;  %v874_v4 = vpop.xlane.xlu0 %873  ;;  %v888_v28 = vpop.xlane.xlu1 %887  ;;  %1088 = vst [vmem:[%s2543_s26 + $0x38] sm:$0xff] %v2541_v9  ;;  %v1026_v7 = vmul.f32 %v1995_v58, %v994_v2 }
 0x244   : > { %2006 = vrcp.f32 %v874_v4 }
 0x245   : > { %v986_v12 = vsub.f32 2.0, %v954_v3  ;;  %2008 = vrcp.f32 %v888_v28  ;;  %v2548_v56 = vmul.f32 %v2398_v0, %v1026_v7 }
 0x246   : > { %v1999_v13 = vpop.eup %1998 }
 0x247   : > { %v2001_v16 = vpop.eup %2000  ;;  %v1018_v35 = vmul.f32 %v1997_v34, %v986_v12  ;;  %v953_v27 = vmul.f32 %v1999_v13, %v858_v23  ;;  %v878_v19 = vpop.xlane.xlu0 %877  ;;  %1090 = vst [vmem:[%s2543_s26 + $0x48] sm:$0xff] %v2548_v56 }
 0x248   : > { %v892_v38 = vpop.xlane.xlu1 %891  ;;  %v964_v11 = vmul.f32 %v2001_v16, %v880_v55  ;;  %2010 = vrcp.f32 %v878_v19 }
 0x249   : > { %v1050_v39 = vmul.f32 %v2404_v6, %v1018_v35  ;;  %v985_v37 = vsub.f32 2.0, %v953_v27  ;;  %2012 = vrcp.f32 %v892_v38 }
 0x24a   : > { %v2003_v41 = vpop.eup %2002  ;;  %v996_v43 = vsub.f32 2.0, %v964_v11 }
 0x24b   : > { %v2005_v49 = vpop.eup %2004  ;;  %1082 = vst [vmem:[%s2543_s26 + $0x8] sm:$0xff] %v1050_v39  ;;  %v1017_v0 = vmul.f32 %v1999_v13, %v985_v37  ;;  %v959_v24 = vmul.f32 %v2003_v41, %v870_v61  ;;  %v882_v52 = vpop.xlane.xlu0 %881 }
 0x24c   : > { %v896_v31 = vpop.xlane.xlu1 %895  ;;  %v1028_v33 = vmul.f32 %v2001_v16, %v996_v43  ;;  %v966_v23 = vmul.f32 %v2005_v49, %v884_v62  ;;  %2014 = vrcp.f32 %v882_v52 }
 0x24d   : > { %v991_v55 = vsub.f32 2.0, %v959_v24  ;;  %2016 = vrcp.f32 %v896_v31  ;;  %v1049_v57 = vmul.f32 %v2414_v17, %v1017_v0 }
 0x24e   : > { %v2007_v6 = vpop.eup %2006  ;;  %v998_v58 = vsub.f32 2.0, %v966_v23  ;;  %v2556_v59 = vmul.f32 %v2416_v18, %v1028_v33 }
 0x24f   : > { %v2009_v25 = vpop.eup %2008  ;;  %v961_v34 = vmul.f32 %v2007_v6, %v874_v4  ;;  %1081 = vst [vmem:[%s2543_s26] sm:$0xff] %v1049_v57  ;;  %1767 = vmatprep.mubr.f32.mxu0 %v1049_v57  ;;  %v886_v61 = vpop.xlane.xlu0 %885  ;;  %v1023_v3 = vmul.f32 %v2003_v41, %v991_v55 }
 0x250   : > { %v900_v2 = vpop.xlane.xlu1 %899  ;;  %v1030_v62 = vmul.f32 %v2005_v49, %v998_v58  ;;  %v968_v7 = vmul.f32 %v2009_v25, %v888_v28  ;;  %2018 = vrcp.f32 %v886_v61  ;;  %1768 = vmatmul.mubr.f32.vlgmr.msra.gmra.mrb[32].mxu0 %v1050_v39  ;;  %1092 = vst [vmem:[%s2543_s26 + $0x58] sm:$0xff] %v2556_v59 }
 0x251   : > { %v993_v17 = vsub.f32 2.0, %v961_v34  ;;  %2020 = vrcp.f32 %v900_v2  ;;  %v1055_v18 = vmul.f32 %v2424_v44, %v1023_v3 }
 0x252   : > { %v2011_v12 = vpop.eup %2010  ;;  %v1000_v13 = vsub.f32 2.0, %v968_v7  ;;  %v2563_v4 = vmul.f32 %v2426_v45, %v1030_v62 }
 0x253   : > { %v2013_v16 = vpop.eup %2012  ;;  %v1025_v35 = vmul.f32 %v2007_v6, %v993_v17  ;;  %v963_v27 = vmul.f32 %v2011_v12, %v878_v19  ;;  %1087 = vst [vmem:[%s2543_s26 + $0x30] sm:$0xff] %v1055_v18  ;;  %1776 = vmatprep.mubr.f32.mxu1 %v1055_v18  ;;  %v890_v28 = vpop.xlane.xlu0 %889 }
 0x254   : > { %v904_v11 = vpop.xlane.xlu1 %903  ;;  %v1032_v39 = vmul.f32 %v2009_v25, %v1000_v13  ;;  %v970_v37 = vmul.f32 %v2013_v16, %v892_v38  ;;  %2022 = vrcp.f32 %v890_v28  ;;  %1777 = vmatmul.mubr.f32.vlgmr.msra.gmra.mrb[0].mxu1 %v2541_v9  ;;  %1094 = vst [vmem:[%s2543_s26 + $0x68] sm:$0xff] %v2563_v4 }
 0x255   : > { %v995_v44 = vsub.f32 2.0, %v963_v27  ;;  %2024 = vrcp.f32 %v904_v11  ;;  %v1057_v45 = vmul.f32 %v2434_v53, %v1025_v35 }
 0x256   : > { %v2015_v41 = vpop.eup %2014  ;;  %v1002_v43 = vsub.f32 2.0, %v970_v37  ;;  %v2571_v19 = vmul.f32 %v2436_v54, %v1032_v39 }
 0x257   : > { %v2017_v49 = vpop.eup %2016  ;;  %v1027_v0 = vmul.f32 %v2011_v12, %v995_v44  ;;  %v965_v24 = vmul.f32 %v2015_v41, %v882_v52  ;;  %v894_v33 = vpop.xlane.xlu0 %893  ;;  %1089 = vst [vmem:[%s2543_s26 + $0x40] sm:$0xff] %v1057_v45  ;;  %1779 = vmatprep.mubr.f32.mxu1 %v1057_v45 }
 0x258   : > { %v908_v38 = vpop.xlane.xlu1 %907  ;;  %v1034_v9 = vmul.f32 %v2013_v16, %v1002_v43  ;;  %v972_v23 = vmul.f32 %v2017_v49, %v896_v31  ;;  %2026 = vrcp.f32 %v894_v33  ;;  %1780 = vmatmul.mubr.f32.gmra.mrb[2].mxu1 %v2548_v56  ;;  %1096 = vst [vmem:[%s2543_s26 + $0x78] sm:$0xff] %v2571_v19 }
 0x259   : > { %v997_v53 = vsub.f32 2.0, %v965_v24  ;;  %2028 = vrcp.f32 %v908_v38  ;;  %v1059_v54 = vmul.f32 %v2444_v63, %v1027_v0 }
 0x25a   : > { %v2019_v55 = vpop.eup %2018  ;;  %v1004_v57 = vsub.f32 2.0, %v972_v23  ;;  %v2579_v52 = vmul.f32 %v2446_v1, %v1034_v9 }
 0x25b   : > { %v2021_v6 = vpop.eup %2020  ;;  %v1029_v58 = vmul.f32 %v2015_v41, %v997_v53  ;;  %v967_v25 = vmul.f32 %v2019_v55, %v886_v61  ;;  %v898_v34 = vpop.xlane.xlu0 %897  ;;  %1091 = vst [vmem:[%s2543_s26 + $0x50] sm:$0xff] %v1059_v54  ;;  %1782 = vmatprep.mubr.f32.mxu1 %v1059_v54 }
 0x25c   : > { %v1036_v31 = vmul.f32 %v2017_v49, %v1004_v57  ;;  %v974_v56 = vmul.f32 %v2021_v6, %v900_v2  ;;  %2030 = vrcp.f32 %v898_v34  ;;  %v912_v3 = vpop.xlane.xlu1 %911  ;;  %1783 = vmatmul.mubr.f32.gmra.mrb[4].mxu1 %v2556_v59  ;;  %1098 = vst [vmem:[%s2543_s26 + $0x88] sm:$0xff] %v2579_v52 }
 0x25d   : > { %v999_v63 = vsub.f32 2.0, %v967_v25  ;;  %2032 = vrcp.f32 %v912_v3  ;;  %v1061_v1 = vmul.f32 %v2454_v14, %v1029_v58 }
 0x25e   : > { %v2023_v62 = vpop.eup %2022  ;;  %v1006_v7 = vsub.f32 2.0, %v974_v56  ;;  %v2587_v61 = vmul.f32 %v2456_v15, %v1036_v31 }
 0x25f   : > { %v2025_v17 = vpop.eup %2024  ;;  %v1031_v18 = vmul.f32 %v2019_v55, %v999_v63  ;;  %v969_v12 = vmul.f32 %v2023_v62, %v890_v28  ;;  %v902_v2 = vpop.xlane.xlu0 %901  ;;  %1093 = vst [vmem:[%s2543_s26 + $0x60] sm:$0xff] %v1061_v1  ;;  %1785 = vmatprep.mubr.f32.mxu1 %v1061_v1 }
 0x260   : > { %v1038_v13 = vmul.f32 %v2021_v6, %v1006_v7  ;;  %v976_v59 = vmul.f32 %v2025_v17, %v904_v11  ;;  %2034 = vrcp.f32 %v902_v2  ;;  %v910_v16 = vpop.xlane.xlu1 %909  ;;  %1786 = vmatmul.mubr.f32.gmra.mrb[6].mxu1 %v2563_v4  ;;  %1100 = vst [vmem:[%s2543_s26 + $0x98] sm:$0xff] %v2587_v61 }
 0x261   : > { %v1001_v14 = vsub.f32 2.0, %v969_v12  ;;  %2036 = vrcp.f32 %v910_v16  ;;  %v1063_v15 = vmul.f32 %v2464_v42, %v1031_v18 }
 0x262   : > { %v2027_v35 = vpop.eup %2026  ;;  %v1008_v27 = vsub.f32 2.0, %v976_v59  ;;  %v2595_v28 = vmul.f32 %v2466_v29, %v1038_v13 }
 0x263   : > { %v2029_v39 = vpop.eup %2028  ;;  %v1033_v37 = vmul.f32 %v2023_v62, %v1001_v14  ;;  %v971_v44 = vmul.f32 %v2027_v35, %v894_v33  ;;  %v906_v11 = vpop.xlane.xlu0 %905  ;;  %1095 = vst [vmem:[%s2543_s26 + $0x70] sm:$0xff] %v1063_v15  ;;  %1788 = vmatprep.mubr.f32.mxu1 %v1063_v15 }
 0x264   : > { %v1040_v45 = vmul.f32 %v2025_v17, %v1008_v27  ;;  %v978_v4 = vmul.f32 %v2029_v39, %v908_v38  ;;  %2038 = vrcp.f32 %v906_v11  ;;  %v916_v41 = vpop.xlane.xlu1 %915  ;;  %1789 = vmatmul.mubr.f32.gmra.mrb[8].mxu1 %v2571_v19  ;;  %1102 = vst [vmem:[%s2543_s26 + $0xa8] sm:$0xff] %v2595_v28 }
 0x265   : > { %v1003_v42 = vsub.f32 2.0, %v971_v44  ;;  %2040 = vrcp.f32 %v916_v41  ;;  %v1065_v29 = vmul.f32 %v2474_v50, %v1033_v37 }
 0x266   : > { %v2031_v43 = vpop.eup %2030  ;;  %v1010_v49 = vsub.f32 2.0, %v978_v4  ;;  %v2603_v0 = vmul.f32 %v2476_v51, %v1040_v45 }
 0x267   : > { %v2033_v24 = vpop.eup %2032  ;;  %v1035_v33 = vmul.f32 %v2027_v35, %v1003_v42  ;;  %v973_v9 = vmul.f32 %v2031_v43, %v898_v34  ;;  %v862_v38 = vpop.xlane.xlu0 %861  ;;  %1097 = vst [vmem:[%s2543_s26 + $0x80] sm:$0xff] %v1065_v29  ;;  %1791 = vmatprep.mubr.f32.mxu1 %v1065_v29 }
 0x268   : > { %v1042_v23 = vmul.f32 %v2029_v39, %v1010_v49  ;;  %v980_v19 = vmul.f32 %v2033_v24, %v912_v3  ;;  %2042 = vrcp.f32 %v862_v38  ;;  %v914_v53 = vpop.xlane.xlu1 %913  ;;  %1792 = vmatmul.mubr.f32.gmra.mrb[10].mxu1 %v2579_v52  ;;  %1104 = vst [vmem:[%s2543_s26 + $0xb8] sm:$0xff] %v2603_v0 }
 0x269   : > { %v1005_v50 = vsub.f32 2.0, %v973_v9  ;;  %2044 = vrcp.f32 %v914_v53  ;;  %v1067_v51 = vmul.f32 %v2484_v26, %v1035_v33 }
 0x26a   : > { %v2035_v54 = vpop.eup %2034  ;;  %v1012_v55 = vsub.f32 2.0, %v980_v19  ;;  %v1074_v57 = vmul.f32 %v2486_v60, %v1042_v23 }
 0x26b   : > { %v2037_v6 = vpop.eup %2036  ;;  %v1037_v58 = vmul.f32 %v2031_v43, %v1005_v50  ;;  %v975_v25 = vmul.f32 %v2035_v54, %v902_v2  ;;  %v864_v34 = vpop.xlane.xlu0 %863  ;;  %1099 = vst [vmem:[%s2543_s26 + $0x90] sm:$0xff] %v1067_v51  ;;  %1794 = vmatprep.mubr.f32.mxu1 %v1067_v51 }
 0x26c   : > { %v1044_v31 = vmul.f32 %v2033_v24, %v1012_v55  ;;  %v979_v52 = vmul.f32 %v2037_v6, %v910_v16  ;;  %2046 = vrcp.f32 %v864_v34  ;;  %v918_v56 = vpop.xlane.xlu1 %917  ;;  %1795 = vmatmul.mubr.f32.gmra.mrb[12].mxu1 %v2587_v61  ;;  %1106 = vst [vmem:[%s2543_s26 + $0xc8] sm:$0xff] %v1074_v57 }
 0x26d   : > { %v1007_v3 = vsub.f32 2.0, %v975_v25  ;;  %2048 = vrcp.f32 %v918_v56  ;;  %v1069_v26 = vmul.f32 %v2494_v5, %v1037_v58 }
 0x26e   : > { %v2039_v60 = vpop.eup %2038  ;;  %v1011_v63 = vsub.f32 2.0, %v979_v52  ;;  %v1076_v1 = vmul.f32 %v2496_v8, %v1044_v31 }
 0x26f   : > { %v2041_v62 = vpop.eup %2040  ;;  %v1039_v7 = vmul.f32 %v2035_v54, %v1007_v3  ;;  %v977_v17 = vmul.f32 %v2039_v60, %v906_v11  ;;  %v866_v18 = vpop.xlane.xlu0 %865  ;;  %1101 = vst [vmem:[%s2543_s26 + $0xa0] sm:$0xff] %v1069_v26  ;;  %1797 = vmatprep.mubr.f32.mxu1 %v1069_v26 }
 0x270   : > { %v1043_v12 = vmul.f32 %v2037_v6, %v1011_v63  ;;  %v982_v2 = vmul.f32 %v2041_v62, %v916_v41  ;;  %2050 = vrcp.f32 %v866_v18  ;;  %v920_v61 = vpop.xlane.xlu1 %919  ;;  %1798 = vmatmul.mubr.f32.gmra.mrb[14].mxu1 %v2595_v28  ;;  %1108 = vst [vmem:[%s2543_s26 + $0xd8] sm:$0xff] %v1076_v1 }
 0x271   : > { %v1009_v13 = vsub.f32 2.0, %v977_v17  ;;  %2052 = vrcp.f32 %v920_v61  ;;  %v1071_v5 = vmul.f32 %v2502_v20, %v1039_v7 }
 0x272   : > { %v2043_v8 = vpop.eup %2042  ;;  %v1014_v59 = vsub.f32 2.0, %v982_v2  ;;  %v1075_v16 = vmul.f32 %v2504_v30, %v1043_v12 }
 0x273   : > { %v2045_v14 = vpop.eup %2044  ;;  %v1041_v15 = vmul.f32 %v2039_v60, %v1009_v13  ;;  %v955_v35 = vmul.f32 %v2043_v8, %v862_v38  ;;  %v868_v27 = vpop.xlane.xlu0 %867  ;;  %1103 = vst [vmem:[%s2543_s26 + $0xb0] sm:$0xff] %v1071_v5  ;;  %1800 = vmatprep.mubr.f32.mxu1 %v1071_v5 }
 0x274   : > { %v1046_v39 = vmul.f32 %v2041_v62, %v1014_v59  ;;  %v981_v37 = vmul.f32 %v2045_v14, %v914_v53  ;;  %2054 = vrcp.f32 %v868_v27  ;;  %1801 = vmatmul.mubr.f32.gmra.mrb[16].mxu1 %v2603_v0  ;;  %1107 = vst [vmem:[%s2543_s26 + $0xd0] sm:$0xff] %v1075_v16 }
 0x275   : > { %v987_v28 = vsub.f32 2.0, %v955_v35  ;;  %v1073_v20 = vmul.f32 %v2510_v40, %v1041_v15 }
 0x276   : > { %v2047_v44 = vpop.eup %2046  ;;  %v1013_v11 = vsub.f32 2.0, %v981_v37  ;;  %v1078_v30 = vmul.f32 %v2512_v22, %v1046_v39 }
 0x277   : > { %v2049_v45 = vpop.eup %2048  ;;  %v1019_v4 = vmul.f32 %v2043_v8, %v987_v28  ;;  %v956_v41 = vmul.f32 %v2047_v44, %v864_v34  ;;  %1105 = vst [vmem:[%s2543_s26 + $0xc0] sm:$0xff] %v1073_v20  ;;  %1803 = vmatprep.mubr.f32.mxu1 %v1073_v20 }
 0x278   : > { %v1045_v42 = vmul.f32 %v2045_v14, %v1013_v11  ;;  %v983_v29 = vmul.f32 %v2049_v45, %v918_v56  ;;  %1804 = vmatmul.mubr.f32.gmra.mrb[18].mxu1 %v1074_v57  ;;  %1110 = vst [vmem:[%s2543_s26 + $0xe8] sm:$0xff] %v1078_v30 }
 0x279   : > { %v988_v43 = vsub.f32 2.0, %v956_v41  ;;  %1806 = vmatprep.mubr.f32.mxu1 %v1075_v16  ;;  %v1051_v49 = vmul.f32 %v2516_v46, %v1019_v4 }
 0x27a   : > { %v2051_v40 = vpop.eup %2050  ;;  %v1015_v0 = vsub.f32 2.0, %v983_v29  ;;  %v1077_v24 = vmul.f32 %v2518_v10, %v1045_v42 }
 0x27b   : > { %v2053_v22 = vpop.eup %2052  ;;  %v1020_v33 = vmul.f32 %v2047_v44, %v988_v43  ;;  %v957_v9 = vmul.f32 %v2051_v40, %v866_v18  ;;  %1083 = vst [vmem:[%s2543_s26 + $0x10] sm:$0xff] %v1051_v49  ;;  %1770 = vmatprep.mubr.f32.mxu0 %v1051_v49 }
 0x27c   : > { %v1047_v38 = vmul.f32 %v2049_v45, %v1015_v0  ;;  %v984_v23 = vmul.f32 %v2053_v22, %v920_v61  ;;  %1807 = vmatmul.mubr.f32.gmra.mrb[20].mxu1 %v1076_v1  ;;  %1109 = vst [vmem:[%s2543_s26 + $0xe0] sm:$0xff] %v1077_v24 }
 0x27d   : > { %v989_v19 = vsub.f32 2.0, %v957_v9  ;;  %1809 = vmatprep.mubr.f32.mxu1 %v1077_v24  ;;  %v1052_v53 = vmul.f32 %v2522_v36, %v1020_v33 }
 0x27e   : > { %v2055_v46 = vpop.eup %2054  ;;  %v1016_v50 = vsub.f32 2.0, %v984_v23  ;;  %v1079_v10 = vmul.f32 %v2524_v21, %v1047_v38 }
 0x27f   : > { %v1021_v51 = vmul.f32 %v2051_v40, %v989_v19  ;;  %v958_v54 = vmul.f32 %v2055_v46, %v868_v27  ;;  %1084 = vst [vmem:[%s2543_s26 + $0x18] sm:$0xff] %v1052_v53  ;;  %1771 = vmatmul.mubr.f32.gmra.mrb[34].mxu0 %v1052_v53 }
 0x280   : > { %v1048_v55 = vmul.f32 %v2053_v22, %v1016_v50  ;;  %1810 = vmatmul.mubr.f32.gmra.mrb[22].mxu1 %v1078_v30  ;;  %1111 = vst [vmem:[%s2543_s26 + $0xf0] sm:$0xff] %v1079_v10 }
 0x281   : > { %v990_v57 = vsub.f32 2.0, %v958_v54  ;;  %1812 = vmatprep.mubr.f32.mxu1 %v1079_v10  ;;  %v1053_v36 = vmul.f32 %v2528_v47, %v1021_v51 }
 0x282   : > { %v1080_v6 = vmul.f32 %v2530_v32, %v1048_v55 }
 0x283   : > { %v1022_v58 = vmul.f32 %v2055_v46, %v990_v57  ;;  %1085 = vst [vmem:[%s2543_s26 + $0x20] sm:$0xff] %v1053_v36  ;;  %1773 = vmatprep.mubr.f32.mxu0 %v1053_v36 }
 0x284   : > { %1112 = vst [vmem:[%s2543_s26 + $0xf8] sm:$0xff] %v1080_v6  ;;  %1813 = vmatmul.mubr.f32.gmra.mrb[24].mxu1 %v1080_v6 }
 0x285   : > { %v1054_v21 = vmul.f32 %v2534_v48, %v1022_v58 }
 0x287   : > { %1086 = vst [vmem:[%s2543_s26 + $0x28] sm:$0xff] %v1054_v21  ;;  %1774 = vmatmul.mubr.f32.gmra.mrb[36].mxu0 %v1054_v21 }
 0x288   : > { %2069 = shalt.err (!%p2066_p5)
}
 0x289   : > { %s2070_s14 = scalar_lea.hbm %s2647_s9, 4096  ;;  %s2074_s24 = scalar_lea.hbm %s2774_s4, 8192 }
 0x28a   : > { %p2071_p6 = scmp.ne.s32.totalorder %s2647_s9, %s2070_s14  ;;  %p2075_p10 = scmp.lt.u32.totalorder %s2647_s9, %s2774_s4 }
 0x28b   : > { %p2076_p11 = scmp.lt.u32.totalorder %s2074_s24, %s2070_s14  ;;  %p2078_p13 = scmp.lt.u32.totalorder %s2070_s14, %s2647_s9 }
 0x28c   : > { %p2072_p7 = pnand %p2071_p6, %p2204_p4 }
 0x28d   : > { %p2077_p12 = por %p2076_p11, %p2075_p10 }
 0x28e   : > { %p2073_p9 = pneg %p2072_p7 }
 0x28f   : > { %p2079_p0 = por %p2078_p13, %p2077_p12 }
 0x291   : > { %p2080_p1 = pnand %p2079_p0, %p2073_p9 }
 0x293   : > { %2083 = shalt.err (!%p2080_p1)
}
 0x294   : > { %s2137_s7 = smov 128   ;;  %s2138_s8 = smov 8  }
 0x295   : > { %1871 = dma.vmem_to_hbm [thread:$0]  (%p2204_p4), %s2649_s6, 4096, %s2647_s9, %s2653_s10, %s2137_s7, %s2137_s7, %s2138_s8  }
 0x296   : > { %s2682_s12 = scalar_lea.vmem %s2773_s3, %s1590_s30 }
 0x323   : > { %v1769_v47 = vpop.f32.mrb[32].mxu0 }
 0x324   : > { %1339 = vst.msk [vmem:[%s2682_s12 + $0x8] sm:$0xff] %vm375_vm0, %v1769_v47  ;;  %v1179_v32 = vpop.f32.mrb[33].mxu0 }
 0x325   : > { %1338 = vst.msk [vmem:[%s2682_s12] sm:$0xff] %vm375_vm0, %v1179_v32 }
 0x327   : > { %v1778_v48 = vpop.f32.mrb[0].mxu1 }
 0x328   : > { %1345 = vst.msk [vmem:[%s2682_s12 + $0x38] sm:$0xff] %vm375_vm0, %v1778_v48  ;;  %v1209_v25 = vpop.f32.mrb[1].mxu1 }
 0x329   : > { %1344 = vst.msk [vmem:[%s2682_s12 + $0x30] sm:$0xff] %vm375_vm0, %v1209_v25 }
 0x32b   : > { %v1781_v34 = vpop.f32.mrb[2].mxu1 }
 0x32c   : > { %1347 = vst.msk [vmem:[%s2682_s12 + $0x48] sm:$0xff] %vm375_vm0, %v1781_v34  ;;  %v1219_v31 = vpop.f32.mrb[3].mxu1 }
 0x32d   : > { %1346 = vst.msk [vmem:[%s2682_s12 + $0x40] sm:$0xff] %vm375_vm0, %v1219_v31 }
 0x32f   : > { %v1784_v52 = vpop.f32.mrb[4].mxu1 }
 0x330   : > { %1349 = vst.msk [vmem:[%s2682_s12 + $0x58] sm:$0xff] %vm375_vm0, %v1784_v52  ;;  %v1229_v56 = vpop.f32.mrb[5].mxu1 }
 0x331   : > { %1348 = vst.msk [vmem:[%s2682_s12 + $0x50] sm:$0xff] %vm375_vm0, %v1229_v56 }
 0x333   : > { %v1787_v3 = vpop.f32.mrb[6].mxu1 }
 0x334   : > { %1351 = vst.msk [vmem:[%s2682_s12 + $0x68] sm:$0xff] %vm375_vm0, %v1787_v3  ;;  %v1239_v26 = vpop.f32.mrb[7].mxu1 }
 0x335   : > { %1350 = vst.msk [vmem:[%s2682_s12 + $0x60] sm:$0xff] %vm375_vm0, %v1239_v26 }
 0x337   : > { %v1790_v60 = vpop.f32.mrb[8].mxu1 }
 0x338   : > { %1353 = vst.msk [vmem:[%s2682_s12 + $0x78] sm:$0xff] %vm375_vm0, %v1790_v60  ;;  %v1249_v63 = vpop.f32.mrb[9].mxu1 }
 0x339   : > { %1352 = vst.msk [vmem:[%s2682_s12 + $0x70] sm:$0xff] %vm375_vm0, %v1249_v63 }
 0x33b   : > { %v1793_v1 = vpop.f32.mrb[10].mxu1 }
 0x33c   : > { %1355 = vst.msk [vmem:[%s2682_s12 + $0x88] sm:$0xff] %vm375_vm0, %v1793_v1  ;;  %v1259_v62 = vpop.f32.mrb[11].mxu1 }
 0x33d   : > { %1354 = vst.msk [vmem:[%s2682_s12 + $0x80] sm:$0xff] %vm375_vm0, %v1259_v62 }
 0x33f   : > { %v1796_v7 = vpop.f32.mrb[12].mxu1 }
 0x340   : > { %1357 = vst.msk [vmem:[%s2682_s12 + $0x98] sm:$0xff] %vm375_vm0, %v1796_v7  ;;  %v1269_v17 = vpop.f32.mrb[13].mxu1 }
 0x341   : > { %1356 = vst.msk [vmem:[%s2682_s12 + $0x90] sm:$0xff] %vm375_vm0, %v1269_v17 }
 0x343   : > { %v1799_v18 = vpop.f32.mrb[14].mxu1 }
 0x344   : > { %1359 = vst.msk [vmem:[%s2682_s12 + $0xa8] sm:$0xff] %vm375_vm0, %v1799_v18  ;;  %v1279_v12 = vpop.f32.mrb[15].mxu1 }
 0x345   : > { %1358 = vst.msk [vmem:[%s2682_s12 + $0xa0] sm:$0xff] %vm375_vm0, %v1279_v12 }
 0x347   : > { %v1802_v2 = vpop.f32.mrb[16].mxu1 }
 0x348   : > { %1361 = vst.msk [vmem:[%s2682_s12 + $0xb8] sm:$0xff] %vm375_vm0, %v1802_v2  ;;  %v1289_v61 = vpop.f32.mrb[17].mxu1 }
 0x349   : > { %1360 = vst.msk [vmem:[%s2682_s12 + $0xb0] sm:$0xff] %vm375_vm0, %v1289_v61 }
 0x34b   : > { %v1805_v13 = vpop.f32.mrb[18].mxu1 }
 0x34c   : > { %1363 = vst.msk [vmem:[%s2682_s12 + $0xc8] sm:$0xff] %vm375_vm0, %v1805_v13  ;;  %v1299_v5 = vpop.f32.mrb[19].mxu1 }
 0x34d   : > { %1362 = vst.msk [vmem:[%s2682_s12 + $0xc0] sm:$0xff] %vm375_vm0, %v1299_v5 }
 0x34f   : > { %v1808_v8 = vpop.f32.mrb[20].mxu1 }
 0x350   : > { %1365 = vst.msk [vmem:[%s2682_s12 + $0xd8] sm:$0xff] %vm375_vm0, %v1808_v8  ;;  %v1309_v59 = vpop.f32.mrb[21].mxu1 }
 0x351   : > { %1364 = vst.msk [vmem:[%s2682_s12 + $0xd0] sm:$0xff] %vm375_vm0, %v1309_v59 }
 0x352   : > { %v1772_v16 = vpop.f32.mrb[34].mxu0 }
 0x353   : > { %1341 = vst.msk [vmem:[%s2682_s12 + $0x18] sm:$0xff] %vm375_vm0, %v1772_v16  ;;  %v1189_v14 = vpop.f32.mrb[35].mxu0  ;;  %v1811_v15 = vpop.f32.mrb[22].mxu1 }
 0x354   : > { %1340 = vst.msk [vmem:[%s2682_s12 + $0x10] sm:$0xff] %vm375_vm0, %v1189_v14  ;;  %1367 = vst.msk [vmem:[%s2682_s12 + $0xe8] sm:$0xff] %vm375_vm0, %v1811_v15  ;;  %v1319_v35 = vpop.f32.mrb[23].mxu1 }
 0x355   : > { %1366 = vst.msk [vmem:[%s2682_s12 + $0xe0] sm:$0xff] %vm375_vm0, %v1319_v35 }
 0x357   : > { %v1814_v27 = vpop.f32.mrb[24].mxu1 }
 0x358   : > { %1369 = vst.msk [vmem:[%s2682_s12 + $0xf8] sm:$0xff] %vm375_vm0, %v1814_v27  ;;  %v1329_v39 = vpop.f32.mrb[25].mxu1 }
 0x359   : > { %1368 = vst.msk [vmem:[%s2682_s12 + $0xf0] sm:$0xff] %vm375_vm0, %v1329_v39 }
 0x35a   : > { %v1775_v37 = vpop.f32.mrb[36].mxu0 }
 0x35b   : > { %1343 = vst.msk [vmem:[%s2682_s12 + $0x28] sm:$0xff] %vm375_vm0, %v1775_v37  ;;  %v1199_v28 = vpop.f32.mrb[37].mxu0 }
 0x35c   : > { %1342 = vst.msk [vmem:[%s2682_s12 + $0x20] sm:$0xff] %vm375_vm0, %v1199_v28 }
 0x35d PF: > { %p1877_p4 = scmp.ge.s32.totalorder %s2134_s20, 2  ;;  %s1426_s25 = sand.u32 1, %s2114_s15  }
 0x35e   : > { %s1427_s29 = scalar_lea.sflag [#allocation3], %s1426_s25 }
 0x35f   : > { %p1874_p2 = pnand %p1877_p4, %p2211_p8 }
 0x361   : > { %2109 = dma.done.wait (!%p1874_p2), %s1427_s29, 4096  }
 0x362   : > { %2111 = vsyncadd (!%p1874_p2), %s1427_s29, 4294963200  ;;  %s18_s20 = sadd.s32 1, %s2134_s20   ;;  %s2777_s15 = smov %s2118_s16 }
 0x363   : > { %p15_p3 = scmp.ge.s32.totalorder %s18_s20, 4   ;;  %s2778_s16 = smov %s2122_s17 }
 0x364   : > { %s2779_s17 = smov %s2217_s28  ;;  %s2780_s18 = smov %s2130_s19 }
 0x365   : > { %s2781_s19 = smov %s2783_s23  ;;  %17 = sbr.rel (!%p15_p3) target bundleno = 4 (0x4), region = 85 }
 0x36c   :  { %1432 = vsyncpa [#allocation3], 1 }
 0x36d   :  { %1434 = vsyncpa [#allocation3 + $0x1], 1 }

</bundles_post_ra>
